<compile_context>
chip_gen: v7x
topology: tpu7x:2x2x1
jax: 0.10.0
libtpu: 0.0.40
codegen_flags: <defaults>
</compile_context>

<pallas_src>
import jax
import jax.numpy as jnp
from jax.experimental import pallas as pl
from jax.experimental.pallas import tpu as pltpu

NEG_SLOPE = 0.01  # nn.LeakyReLU() default


def _leaky_relu(x):
    return jnp.where(x > 0, x, NEG_SLOPE * x)


def _encoder_kernel(x_ref, w1_ref, b1_ref, w2_ref, b2_ref, o_ref):
    # x_ref:  (C_in, TN)  channels on sublanes, pixels on lanes (lane-dense)
    # w1_ref: (D1, C_in)  first 1x1 conv weight (C_out, C_in)
    # b1_ref: (D1, 1)     broadcast along lanes
    # w2_ref: (D2, D1)
    # b2_ref: (D2, 1)
    # o_ref:  (D2, TN)    lane-dense output tile
    x = x_ref[...].astype(jnp.float32)
    h = jnp.dot(w1_ref[...], x, preferred_element_type=jnp.float32) + b1_ref[...]
    h = _leaky_relu(h)
    o = jnp.dot(w2_ref[...], h, preferred_element_type=jnp.float32) + b2_ref[...]
    o = _leaky_relu(o)
    o_ref[...] = o.astype(o_ref.dtype)


def _round_up(v, m):
    return ((v + m - 1) // m) * m


def _encoder_nchw(x, w1, b1, w2, b2, *, max_tile_n=32768,
                  vmem_tile_budget=32 * 1024 * 1024, out_dtype=None):
    """x: (N, C_in, H, W) NCHW.  Returns (N, D2, H, W).  No pads, no transposes.

    max_tile_n: upper bound on the spatial (lane) tile size.
    vmem_tile_budget: budget for the double-buffered in+out tiles (bytes).
    out_dtype: optional narrower output dtype (e.g. bf16) to halve writeback
               traffic if the surrounding model tolerates it; default = x.dtype
               to preserve the PyTorch module's semantics exactly.
    """
    n, c_in, h, w = x.shape
    d1 = w1.shape[0]
    d2 = w2.shape[0]
    hw = h * w
    out_dtype = x.dtype if out_dtype is None else out_dtype

    in_item = jnp.dtype(x.dtype).itemsize
    out_item = jnp.dtype(out_dtype).itemsize
    # Double-buffered input + output tile bytes per spatial lane.
    per_lane = 2 * (c_in * in_item + d2 * out_item)
    budget_lanes = max(128, vmem_tile_budget // per_lane)

    if hw <= min(max_tile_n, budget_lanes):
        # Single spatial block equal to the full dim: no edge masking at all.
        tn = hw
    else:
        tn = max(128, min(max_tile_n, (budget_lanes // 128) * 128))

    num_spatial = pl.cdiv(hw, tn)

    # v7x: two TensorCores share the ("parallel","parallel") grid -- make sure
    # big-enough problems produce at least a handful of steps.
    min_steps = 4
    if n * num_spatial < min_steps and hw >= min_steps * 2048:
        tn_split = _round_up(pl.cdiv(hw, pl.cdiv(min_steps, n)), 128)
        if 2048 <= tn_split < tn:
            tn = tn_split
            num_spatial = pl.cdiv(hw, tn)

    # Free reshape: stays in NCHW memory order.  No jnp.pad and no output
    # slice -- any ragged trailing block is handled by Pallas' masked DMA.
    x3 = x.reshape(n, c_in, hw)

    weight_bytes = 4 * (d1 * c_in + d1 + d2 * d1 + d2)
    tile_bytes = per_lane * tn + 2 * weight_bytes
    # Explicit scoped-VMEM limit: covers v5e's 16 MiB default for large tiles,
    # stays well under v7x's 64 MiB physical VMEM.
    vmem_limit = int(min(48 * 1024 * 1024,
                         max(32 * 1024 * 1024, tile_bytes + (8 << 20))))

    out = pl.pallas_call(
        _encoder_kernel,
        out_shape=jax.ShapeDtypeStruct((n, d2, hw), out_dtype),
        grid_spec=pltpu.PrefetchScalarGridSpec(
            num_scalar_prefetch=0,
            grid=(n, num_spatial),
            in_specs=[
                # Batch dim squeezed out; spatial tiled along lanes.
                pl.BlockSpec((None, c_in, tn), lambda b, s: (b, 0, s)),
                # Weights/biases: constant index_map -> DMA'd once, VMEM-resident.
                pl.BlockSpec((d1, c_in), lambda b, s: (0, 0)),
                pl.BlockSpec((d1, 1), lambda b, s: (0, 0)),
                pl.BlockSpec((d2, d1), lambda b, s: (0, 0)),
                pl.BlockSpec((d2, 1), lambda b, s: (0, 0)),
            ],
            out_specs=pl.BlockSpec((None, d2, tn), lambda b, s: (b, 0, s)),
        ),
        compiler_params=pltpu.CompilerParams(
            dimension_semantics=("parallel", "parallel"),
            vmem_limit_bytes=vmem_limit,
        ),
    )(x3, w1, b1, w2, b2)

    return out.reshape(n, d2, h, w)


class EncoderPallas:
    """JAX/Pallas equivalent of NeuralPlanes Encoder (forward only)."""

    def __init__(self, in_dim, out_dim, alpha=0.7, key=None):
        self.alpha = alpha
        self.out_dim = out_dim
        if key is None:
            key = jax.random.PRNGKey(0)
        k1, k2, k3, k4 = jax.random.split(key, 4)
        # Conv2d 1x1 weights stored as (C_out, C_in); biases as (C_out, 1).
        self.w1 = (jax.random.normal(k1, (out_dim, in_dim), jnp.float32)
                   * (1.0 / jnp.sqrt(in_dim)))
        self.b1 = jax.random.normal(k2, (out_dim, 1), jnp.float32) * 0.01
        self.w2 = (jax.random.normal(k3, (out_dim + 1, out_dim), jnp.float32)
                   * (1.0 / jnp.sqrt(out_dim)))
        self.b2 = jax.random.normal(k4, (out_dim + 1, 1), jnp.float32) * 0.01

    def __call__(self, batch):
        x = batch['image']  # (N, C_in, H, W) -- NCHW, consumed directly
        out = _encoder_nchw(x, self.w1, self.b1, self.w2, self.b2)
        return {'image': out}


def _reference(batch, enc):
    """Pure-JAX reference of the same forward pass (NCHW in / NCHW out)."""
    x = batch['image']
    n, c_in, h, w = x.shape
    xf = x.reshape(n, c_in, h * w)                                   # (N,Cin,P)
    h1 = jnp.einsum('dc,ncp->ndp', enc.w1, xf) + enc.b1[None]        # (N,D1,P)
    h1 = jnp.where(h1 > 0, h1, NEG_SLOPE * h1)
    h2 = jnp.einsum('ed,ndp->nep', enc.w2, h1) + enc.b2[None]        # (N,D2,P)
    h2 = jnp.where(h2 > 0, h2, NEG_SLOPE * h2)
    return h2.reshape(n, enc.w2.shape[0], h, w)


if __name__ == "__main__":
    key = jax.random.PRNGKey(0)
    k_in, k_par, k_in2 = jax.random.split(key, 3)

    # Small shapes consistent with the module: batch=2, in_dim=4, 16x16, out_dim=32.
    N, C_IN, H, W = 2, 4, 16, 16
    OUT_DIM = 32

    enc = EncoderPallas(C_IN, OUT_DIM, key=k_par)

    x = jax.random.normal(k_in, (N, C_IN, H, W), jnp.float32)
    out = enc({'image': x})
    y = jax.block_until_ready(out['image'])

    assert y.shape == (N, OUT_DIM + 1, H, W), y.shape
    ref = _reference({'image': x}, enc)
    assert jnp.allclose(y, ref, atol=1e-5, rtol=1e-5), "mismatch vs reference"

    # Also exercise the ragged / multi-tile spatial path (hw=300 not a multiple
    # of the forced 128-lane tile) to validate the no-pad edge handling.
    x2 = jax.random.normal(k_in2, (1, C_IN, 15, 20), jnp.float32)
    y2 = jax.block_until_ready(
        _encoder_nchw(x2, enc.w1, enc.b1, enc.w2, enc.b2, max_tile_n=128))
    ref2 = _reference({'image': x2}, enc)
    assert y2.shape == ref2.shape, y2.shape
    assert jnp.allclose(y2, ref2, atol=1e-5, rtol=1e-5), "mismatch (ragged tiles)"

    print("KERNEL_OK")
</pallas_src>

<mosaic_0001>
module attributes {stable_mosaic.version = 11 : i64} {
  func.func @_encoder_kernel(%arg0: i32, %arg1: i32, %arg2: memref<1x4x256xf32, #tpu.memory_space<vmem>>, %arg3: memref<32x4xf32, #tpu.memory_space<vmem>>, %arg4: memref<32x1xf32, #tpu.memory_space<vmem>>, %arg5: memref<33x32xf32, #tpu.memory_space<vmem>>, %arg6: memref<33x1xf32, #tpu.memory_space<vmem>>, %arg7: memref<1x33x256xf32, #tpu.memory_space<vmem>>) attributes {dimension_semantics = [#tpu.dimension_semantics<parallel>, #tpu.dimension_semantics<parallel>], iteration_bounds = array<i64: 2, 1>, scalar_prefetch = 0 : i64, scratch_operands = 0 : i64, tpu.core_type = #tpu.core_type<tc>, window_params = [{transform_indices = @transform_0, window_bounds = array<i64: 1, 4, 256>}, {pipeline_mode = #tpu.pipeline_mode<synchronous>, transform_indices = @transform_1, window_bounds = array<i64: 32, 4>}, {pipeline_mode = #tpu.pipeline_mode<synchronous>, transform_indices = @transform_2, window_bounds = array<i64: 32, 1>}, {pipeline_mode = #tpu.pipeline_mode<synchronous>, transform_indices = @transform_3, window_bounds = array<i64: 33, 32>}, {pipeline_mode = #tpu.pipeline_mode<synchronous>, transform_indices = @transform_4, window_bounds = array<i64: 33, 1>}, {transform_indices = @transform_5, window_bounds = array<i64: 1, 33, 256>}]} {
    %c0 = arith.constant 0 : index
    %c0_0 = arith.constant 0 : index
    %c0_1 = arith.constant 0 : index
    %0 = vector.load %arg2[%c0, %c0_0, %c0_1] : memref<1x4x256xf32, #tpu.memory_space<vmem>>, vector<1x4x256xf32>
    %1 = vector.shape_cast %0 : vector<1x4x256xf32> to vector<4x256xf32>
    %c0_2 = arith.constant 0 : index
    %c0_3 = arith.constant 0 : index
    %2 = vector.load %arg3[%c0_2, %c0_3] : memref<32x4xf32, #tpu.memory_space<vmem>>, vector<32x4xf32>
    %cst = arith.constant dense<0.000000e+00> : vector<32x256xf32>
    %3 = tpu.matmul %2, %1, %cst {dimension_numbers = #tpu.dot_dimension_numbers<[1], [0], [0], [1], [0, 0, 1, 1], [], []>} : vector<32x4xf32>, vector<4x256xf32>, vector<32x256xf32> -> vector<32x256xf32>
    %c0_4 = arith.constant 0 : index
    %c0_5 = arith.constant 0 : index
    %4 = vector.load %arg4[%c0_4, %c0_5] : memref<32x1xf32, #tpu.memory_space<vmem>>, vector<32x1xf32>
    %5 = vector.broadcast %4 : vector<32x1xf32> to vector<32x256xf32>
    %6 = arith.addf %3, %5 : vector<32x256xf32>
    %cst_6 = arith.constant 0.000000e+00 : f32
    %7 = vector.broadcast %cst_6 : f32 to vector<32x256xf32>
    %8 = arith.cmpf ogt, %6, %7 : vector<32x256xf32>
    %cst_7 = arith.constant 0.00999999977 : f32
    %9 = vector.broadcast %cst_7 : f32 to vector<32x256xf32>
    %10 = arith.mulf %9, %6 : vector<32x256xf32>
    %11 = arith.select %8, %6, %10 : vector<32x256xi1>, vector<32x256xf32>
    %c0_8 = arith.constant 0 : index
    %c0_9 = arith.constant 0 : index
    %12 = vector.load %arg5[%c0_8, %c0_9] : memref<33x32xf32, #tpu.memory_space<vmem>>, vector<33x32xf32>
    %cst_10 = arith.constant dense<0.000000e+00> : vector<33x256xf32>
    %13 = tpu.matmul %12, %11, %cst_10 {dimension_numbers = #tpu.dot_dimension_numbers<[1], [0], [0], [1], [0, 0, 1, 1], [], []>} : vector<33x32xf32>, vector<32x256xf32>, vector<33x256xf32> -> vector<33x256xf32>
    %c0_11 = arith.constant 0 : index
    %c0_12 = arith.constant 0 : index
    %14 = vector.load %arg6[%c0_11, %c0_12] : memref<33x1xf32, #tpu.memory_space<vmem>>, vector<33x1xf32>
    %15 = vector.broadcast %14 : vector<33x1xf32> to vector<33x256xf32>
    %16 = arith.addf %13, %15 : vector<33x256xf32>
    %cst_13 = arith.constant 0.000000e+00 : f32
    %17 = vector.broadcast %cst_13 : f32 to vector<33x256xf32>
    %18 = arith.cmpf ogt, %16, %17 : vector<33x256xf32>
    %cst_14 = arith.constant 0.00999999977 : f32
    %19 = vector.broadcast %cst_14 : f32 to vector<33x256xf32>
    %20 = arith.mulf %19, %16 : vector<33x256xf32>
    %21 = arith.select %18, %16, %20 : vector<33x256xi1>, vector<33x256xf32>
    %c0_15 = arith.constant 0 : index
    %c0_16 = arith.constant 0 : index
    %c0_17 = arith.constant 0 : index
    %22 = vector.load %arg7[%c0_15, %c0_16, %c0_17] : memref<1x33x256xf32, #tpu.memory_space<vmem>>, vector<1x33x256xf32>
    %23 = vector.shape_cast %22 : vector<1x33x256xf32> to vector<33x256xf32>
    %24 = vector.shape_cast %21 : vector<33x256xf32> to vector<1x33x256xf32>
    tpu.vector_store %arg7[%c0_15, %c0_16, %c0_17], %24 {strides = array<i32>} : memref<1x33x256xf32, #tpu.memory_space<vmem>>, vector<1x33x256xf32>,
    return
  }
  func.func @transform_0(%arg0: i32, %arg1: i32) -> (i32, i32, i32) {
    %c0_i32 = arith.constant 0 : i32
    %c0_i32_0 = arith.constant 0 : i32
    return %arg0, %c0_i32, %arg1 : i32, i32, i32
  }
  func.func @transform_1(%arg0: i32, %arg1: i32) -> (i32, i32) {
    %c0_i32 = arith.constant 0 : i32
    %c0_i32_0 = arith.constant 0 : i32
    %c0_i32_1 = arith.constant 0 : i32
    return %c0_i32, %c0_i32_0 : i32, i32
  }
  func.func @transform_2(%arg0: i32, %arg1: i32) -> (i32, i32) {
    %c0_i32 = arith.constant 0 : i32
    %c0_i32_0 = arith.constant 0 : i32
    %c0_i32_1 = arith.constant 0 : i32
    return %c0_i32, %c0_i32_0 : i32, i32
  }
  func.func @transform_3(%arg0: i32, %arg1: i32) -> (i32, i32) {
    %c0_i32 = arith.constant 0 : i32
    %c0_i32_0 = arith.constant 0 : i32
    %c0_i32_1 = arith.constant 0 : i32
    return %c0_i32, %c0_i32_0 : i32, i32
  }
  func.func @transform_4(%arg0: i32, %arg1: i32) -> (i32, i32) {
    %c0_i32 = arith.constant 0 : i32
    %c0_i32_0 = arith.constant 0 : i32
    %c0_i32_1 = arith.constant 0 : i32
    return %c0_i32, %c0_i32_0 : i32, i32
  }
  func.func @transform_5(%arg0: i32, %arg1: i32) -> (i32, i32, i32) {
    %c0_i32 = arith.constant 0 : i32
    %c0_i32_0 = arith.constant 0 : i32
    return %arg0, %c0_i32, %arg1 : i32, i32, i32
  }
}

</mosaic_0001>

<bundles_post_ra>
// kernel: tpu_custom_call.1
= control target key start
LH: loop header
LB: loop body
LE: loop exit
PB: predicated region body
PF: predicated region fallthrough
CT: control target
= control target key end

     0   :  { %s819_s18 = smov 0   ;;  %s821_s19 = smov 0   ;;  %s935_s0 = inlined_call_operand.vmem [shape: f32[2,4,256], index: 0, kind: input, shape index: {}]   ;;  %s936_s1 = inlined_call_operand.vmem [shape: f32[32,4], index: 1, kind: input, shape index: {}]   ;;  %s937_s2 = inlined_call_operand.vmem [shape: f32[32,1], index: 2, kind: input, shape index: {}]   ;;  %s938_s3 = inlined_call_operand.vmem [shape: f32[33,32], index: 3, kind: input, shape index: {}]   ;;  %s939_s4 = inlined_call_operand.vmem [shape: f32[33,1], index: 4, kind: input, shape index: {}]   ;;  %s940_s5 = inlined_call_operand.vmem [shape: f32[2,33,256], index: 5, kind: output, shape index: {}]  }
   0x1   :  { %s823_s20 = smov 0  }
   0x2 LB: > { %s27_s21 = sadd.s32 1, %s781_s19  ;;  %p703_p0 = scmp.ge.s32.totalorder %s785_s20, 1  ;;  %s785_s20 = sphi %s823_s20, %s15_s20   ;;  %s781_s19 = sphi %s821_s19, %s942_s19   ;;  %s777_s18 = sphi %s819_s18, %s941_s18  }
   0x3   : > { %p29_p1 = scmp.ge.s32.totalorder %s27_s21, 2  ;;  %p208_p2 = scmp.lt.s32.totalorder %s785_s20, 3 }
   0x5   : > { %s944_s21 = smov (%p29_p1, %s27_s21), 0  ;;  %p209_p3 = pnand %p703_p0, %p208_p2 }
   0x6   : > { %p245_p4 = scmp.lt.s32.totalorder (!%p209_p3), %s777_s18, 1  ;;  %v787_v0 = vmov (!%p209_p3), 0.0   ;;  %v269_v1 = vld [vmem:[%s937_s2] sm:$0xff] (!%p209_p3)  ;;  %v788_v2 = vmov (!%p209_p3), 0   ;;  %v271_v3 = vld [vmem:[%s937_s2 + $0x10] sm:$0xff] (!%p209_p3)  ;;  %v270_v4 = vld [vmem:[%s937_s2 + $0x8] sm:$0xff] (!%p209_p3) }
   0x7   : > { %212 = sbr.rel (%p209_p3) target bundleno = 489 (0x1e9), region = 40  ;;  %377 = vmatprep.mubr.f32.mxu0 (!%p209_p3), %v787_v0  ;;  %547 = vmatprep.mubr.f32.mxu1 (!%p209_p3), %v787_v0  ;;  %v272_v5 = vld [vmem:[%s937_s2 + $0x18] sm:$0xff] (!%p209_p3)  ;;  %vm308_vm0 = vcmask (!%p209_p3), 1043456   ;;  %v265_v8 = vld [vmem:[%s936_s1] sm:$0xff] (!%p209_p3)  ;;  %vm295_vm1 = vcmask (!%p209_p3), 31744   ;;  %v432_v10 = vld [vmem:[%s939_s4 + $0x8] sm:$0xff] (!%p209_p3) }
   0x8   : > { %760 = vset.pattern.permute.xlu0 (!%p209_p3), %v788_v2  ;;  %761 = vset.pattern.permute.xlu1 (!%p209_p3), %v788_v2  ;;  %v431_v9 = vld [vmem:[%s939_s4] sm:$0xff] (!%p209_p3)  ;;  %v266_v11 = vld [vmem:[%s936_s1 + $0x8] sm:$0xff] (!%p209_p3)  ;;  %v433_v12 = vld [vmem:[%s939_s4 + $0x10] sm:$0xff] (!%p209_p3)  ;;  %vm461_vm10 = vcmask (!%p209_p3), 261120  }
   0x9   : > { %275 = vperm.xlu0 (!%p209_p3), %760, %v269_v1   ;;  %285 = vperm.xlu1 (!%p209_p3), %761, %v271_v3   ;;  %v434_v13 = vld [vmem:[%s939_s4 + $0x18] sm:$0xff] (!%p209_p3)  ;;  %v267_v14 = vld [vmem:[%s936_s1 + $0x10] sm:$0xff] (!%p209_p3)  ;;  %v435_v15 = vld [vmem:[%s939_s4 + $0x20] sm:$0x1] (!%p209_p3) }
   0xa   : > { %v268_v16 = vld [vmem:[%s936_s1 + $0x18] sm:$0xff] (!%p209_p3)  ;;  %v426_v57 = vld [vmem:[%s938_s3] sm:$0xff] (!%p209_p3)  ;;  %v427_v58 = vld [vmem:[%s938_s3 + $0x8] sm:$0xff] (!%p209_p3) }
   0xb   : > { %v428_v59 = vld [vmem:[%s938_s3 + $0x10] sm:$0xff] (!%p209_p3)  ;;  %v429_v60 = vld [vmem:[%s938_s3 + $0x18] sm:$0xff] (!%p209_p3)  ;;  %v430_v61 = vld [vmem:[%s938_s3 + $0x20] sm:$0x1] (!%p209_p3) }
   0xd   : > { %280 = vperm.xlu0 (!%p209_p3), %760, %v270_v4   ;;  %290 = vperm.xlu1 (!%p209_p3), %761, %v272_v5  }
   0xe   : > { %s946_s18 = smov (!%p245_p4, %s777_s18), 1 }
   0xf   : > { %s720_s26 = sshll.u32 %s946_s18, 3  ;;  %s733_s16 = smul.u32 80, %s946_s18 }
  0x10   : > { %s252_s8 = scalar_lea.vmem %s935_s0, %s720_s26 }
  0x11   : > { %v264_v6 = vld [vmem:[%s252_s8] sm:$0xff]  ;;  %438 = vperm.xlu0 %760, %v431_v9   ;;  %443 = vperm.xlu1 %761, %v432_v10   ;;  %s914_s23 = scalar_lea.vmem %s940_s5, %s733_s16 }
  0x12   : > { %v294_v7 = vcombine.high %v264_v6, %v264_v6 }
  0x14   : > { %707 = vmatprep.subr.msk.mxu0 %vm308_vm0, %v294_v7 }
  0x15   : > { %708 = vmatpush1.msk.msra.mxu0 %vm308_vm0, %v264_v6  ;;  %448 = vperm.xlu0 %760, %v433_v12  }
  0x16   : > { %709 = vmatmul.mubr.msk.f32.vlgmr.msra.gmra.mrb[0].mxu0 %vm295_vm1, %v265_v8  ;;  %453 = vperm.xlu1 %761, %v434_v13  }
  0x17   : > { %383 = vmatprep.mubr.f32.mxu0 %v787_v0 }
  0x19   : > { %458 = vperm.xlu0 %760, %v435_v15  }
  0x1a   : > { %710 = vmatmul.mubr.msk.f32.gmra.mrb[2].mxu0 %vm295_vm1, %v266_v11 }
  0x1b   : > { %389 = vmatprep.mubr.f32.mxu0 %v787_v0 }
  0x1e   : > { %711 = vmatmul.mubr.msk.f32.gmra.mrb[4].mxu0 %vm295_vm1, %v267_v14 }
  0x1f   : > { %395 = vmatprep.mubr.f32.mxu0 %v787_v0 }
  0x22   : > { %712 = vmatmul.mubr.msk.f32.gmra.mrb[6].mxu0 %vm295_vm1, %v268_v16 }
  0x23   : > { %541 = vmatprep.mubr.f32.mxu0 %v787_v0 }
  0x88   : > { %v276_v17 = vpop.permute.xlu0 %275  ;;  %v286_v27 = vpop.permute.xlu1 %285 }
  0x8c   : > { %v281_v22 = vpop.permute.xlu0 %280  ;;  %v291_v42 = vpop.permute.xlu1 %290 }
  0x90   : > { %v439_v62 = vpop.permute.xlu0 %438  ;;  %v444_v63 = vpop.permute.xlu1 %443 }
  0x94   : > { %v449_v12 = vpop.permute.xlu0 %448 }
  0xe9   : > { %v379_v18 = vpop.f32.mrb[0].mxu0 }
  0xea   : > { %v380_v19 = vadd.f32 %v379_v18, %v276_v17  ;;  %v381_v20 = vpop.f32.mrb[1].mxu0 }
  0xeb   : > { %v382_v21 = vadd.f32 %v381_v20, %v276_v17 }
  0xec   : > { %v410_v24 = vmul.f32 0.01, %v380_v19  ;;  %vm402_vm2 = vcmp.gt.f32.partialorder %v380_v19, 0.0 }
  0xed   : > { %v385_v23 = vpop.f32.mrb[2].mxu0  ;;  %v411_v28 = vmul.f32 0.01, %v382_v21  ;;  %vm403_vm3 = vcmp.gt.f32.partialorder %v382_v21, 0.0 }
  0xee   : > { %v386_v25 = vadd.f32 %v385_v23, %v281_v22  ;;  %v387_v26 = vpop.f32.mrb[3].mxu0  ;;  %v418_v33 = vsel %vm402_vm2, %v380_v19, %v410_v24 }
  0xef   : > { %v388_v29 = vadd.f32 %v387_v26, %v281_v22  ;;  %v419_v39 = vsel %vm403_vm3, %v382_v21, %v411_v28  ;;  %v454_v21 = vpop.permute.xlu1 %453 }
  0xf0   : > { %vm404_vm4 = vcmp.gt.f32.partialorder %v386_v25, 0.0  ;;  %v412_v30 = vmul.f32 0.01, %v386_v25 }
  0xf1   : > { %vm405_vm5 = vcmp.gt.f32.partialorder %v388_v29, 0.0  ;;  %v413_v31 = vmul.f32 0.01, %v388_v29  ;;  %v391_v32 = vpop.f32.mrb[4].mxu0 }
  0xf2   : > { %v420_v34 = vsel %vm404_vm4, %v386_v25, %v412_v30  ;;  %v392_v35 = vadd.f32 %v391_v32, %v286_v27  ;;  %v393_v36 = vpop.f32.mrb[5].mxu0 }
  0xf3   : > { %v723_v37 = vpack.c.bf16 %v420_v34, %v418_v33  ;;  %v394_v38 = vadd.f32 %v393_v36, %v286_v27  ;;  %v421_v40 = vsel %vm405_vm5, %v388_v29, %v413_v31  ;;  %v459_v31 = vpop.permute.xlu0 %458 }
  0xf4   : > { %v721_v41 = vpack.c.bf16 %v421_v40, %v419_v39  ;;  %v414_v44 = vmul.f32 0.01, %v392_v35  ;;  %vm406_vm6 = vcmp.gt.f32.partialorder %v392_v35, 0.0 }
  0xf5   : > { %v397_v43 = vpop.f32.mrb[6].mxu0  ;;  %v415_v47 = vmul.f32 0.01, %v394_v38  ;;  %vm407_vm7 = vcmp.gt.f32.partialorder %v394_v38, 0.0 }
  0xf6   : > { %v398_v45 = vadd.f32 %v397_v43, %v291_v42  ;;  %v399_v46 = vpop.f32.mrb[7].mxu0  ;;  %722 = vmatprep.subr.bf16.mxu0 %v721_v41  ;;  %729 = vmatprep.subr.bf16.mxu1 %v721_v41  ;;  %v422_v51 = vsel %vm406_vm6, %v392_v35, %v414_v44 }
  0xf7   : > { %v400_v48 = vadd.f32 %v399_v46, %v291_v42  ;;  %724 = vmatpush1.bf16.msra.mxu0 %v723_v37  ;;  %731 = vmatpush1.bf16.msra.mxu1 %v723_v37  ;;  %v423_v54 = vsel %vm407_vm7, %v394_v38, %v415_v47 }
  0xf8   : > { %vm408_vm8 = vcmp.gt.f32.partialorder %v398_v45, 0.0  ;;  %v416_v49 = vmul.f32 0.01, %v398_v45 }
  0xf9   : > { %vm409_vm9 = vcmp.gt.f32.partialorder %v400_v48, 0.0  ;;  %v417_v50 = vmul.f32 0.01, %v400_v48 }
  0xfa   : > { %v424_v52 = vsel %vm408_vm8, %v398_v45, %v416_v49 }
  0xfb   : > { %v727_v53 = vpack.c.bf16 %v424_v52, %v422_v51  ;;  %v425_v55 = vsel %vm409_vm9, %v400_v48, %v417_v50 }
  0xfc   : > { %v725_v56 = vpack.c.bf16 %v425_v55, %v423_v54 }
  0xfe   : > { %726 = vmatprep.subr.bf16.mxu0 %v725_v56  ;;  %730 = vmatprep.subr.bf16.mxu1 %v725_v56 }
  0xff   : > { %728 = vmatpush1.bf16.msra.mxu0 %v727_v53  ;;  %732 = vmatpush1.bf16.msra.mxu1 %v727_v53 }
 0x102   : > { %713 = vmatmul.mubr.msk.f32.vlgmr.msra.gmra.mrb[8].mxu0 %vm461_vm10, %v426_v57  ;;  %714 = vmatmul.mubr.msk.f32.vlgmr.msra.gmra.mrb[0].mxu1 %vm461_vm10, %v427_v58 }
 0x103   : > { %553 = vmatprep.mubr.f32.mxu1 %v787_v0 }
 0x106   : > { %715 = vmatmul.mubr.msk.f32.gmra.mrb[2].mxu1 %vm461_vm10, %v428_v59 }
 0x107   : > { %559 = vmatprep.mubr.f32.mxu1 %v787_v0 }
 0x10a   : > { %716 = vmatmul.mubr.msk.f32.gmra.mrb[4].mxu1 %vm461_vm10, %v429_v60 }
 0x10b   : > { %565 = vmatprep.mubr.f32.mxu1 %v787_v0 }
 0x10e   : > { %717 = vmatmul.mubr.msk.f32.gmra.mrb[6].mxu1 %vm461_vm10, %v430_v61 }
 0x1d5   : > { %v543_v1 = vpop.f32.mrb[8].mxu0  ;;  %v549_v2 = vpop.f32.mrb[0].mxu1 }
 0x1d6   : > { %v544_v3 = vadd.f32 %v543_v1, %v439_v62  ;;  %v550_v4 = vadd.f32 %v549_v2, %v444_v63  ;;  %v545_v5 = vpop.f32.mrb[9].mxu0  ;;  %v551_v6 = vpop.f32.mrb[1].mxu1 }
 0x1d7   : > { %v546_v7 = vadd.f32 %v545_v5, %v439_v62  ;;  %v552_v8 = vadd.f32 %v551_v6, %v444_v63 }
 0x1d8   : > { %vm572_vm11 = vcmp.gt.f32.partialorder %v544_v3, 0.0  ;;  %v582_v0 = vmul.f32 0.01, %v544_v3  ;;  %vm574_vm12 = vcmp.gt.f32.partialorder %v550_v4, 0.0  ;;  %v584_v9 = vmul.f32 0.01, %v550_v4 }
 0x1d9   : > { %vm573_vm13 = vcmp.gt.f32.partialorder %v546_v7, 0.0  ;;  %v583_v10 = vmul.f32 0.01, %v546_v7  ;;  %vm575_vm14 = vcmp.gt.f32.partialorder %v552_v8, 0.0  ;;  %v585_v11 = vmul.f32 0.01, %v552_v8 }
 0x1da   : > { %v592_v13 = vsel %vm572_vm11, %v544_v3, %v582_v0  ;;  %v594_v14 = vsel %vm574_vm12, %v550_v4, %v584_v9  ;;  %v555_v15 = vpop.f32.mrb[2].mxu1 }
 0x1db   : > { %602 = vst [vmem:[%s914_s23] sm:$0xff] %v592_v13  ;;  %604 = vst [vmem:[%s914_s23 + $0x10] sm:$0xff] %v594_v14  ;;  %v593_v16 = vsel %vm573_vm13, %v546_v7, %v583_v10  ;;  %v595_v17 = vsel %vm575_vm14, %v552_v8, %v585_v11  ;;  %v556_v18 = vadd.f32 %v555_v15, %v449_v12  ;;  %v557_v19 = vpop.f32.mrb[3].mxu1 }
 0x1dc   : > { %603 = vst [vmem:[%s914_s23 + $0x8] sm:$0xff] %v593_v16  ;;  %605 = vst [vmem:[%s914_s23 + $0x18] sm:$0xff] %v595_v17  ;;  %v558_v20 = vadd.f32 %v557_v19, %v449_v12 }
 0x1dd   : > { %vm576_vm15 = vcmp.gt.f32.partialorder %v556_v18, 0.0  ;;  %v586_v22 = vmul.f32 0.01, %v556_v18  ;;  %v561_v23 = vpop.f32.mrb[4].mxu1 }
 0x1de   : > { %vm577_vm0 = vcmp.gt.f32.partialorder %v558_v20, 0.0  ;;  %v587_v24 = vmul.f32 0.01, %v558_v20  ;;  %v562_v25 = vadd.f32 %v561_v23, %v454_v21  ;;  %v563_v26 = vpop.f32.mrb[5].mxu1 }
 0x1df   : > { %v596_v27 = vsel %vm576_vm15, %v556_v18, %v586_v22  ;;  %v564_v28 = vadd.f32 %v563_v26, %v454_v21 }
 0x1e0   : > { %606 = vst [vmem:[%s914_s23 + $0x20] sm:$0xff] %v596_v27  ;;  %v597_v29 = vsel %vm577_vm0, %v558_v20, %v587_v24  ;;  %vm578_vm1 = vcmp.gt.f32.partialorder %v562_v25, 0.0  ;;  %v588_v30 = vmul.f32 0.01, %v562_v25 }
 0x1e1   : > { %607 = vst [vmem:[%s914_s23 + $0x28] sm:$0xff] %v597_v29  ;;  %vm579_vm2 = vcmp.gt.f32.partialorder %v564_v28, 0.0  ;;  %v589_v32 = vmul.f32 0.01, %v564_v28  ;;  %v567_v33 = vpop.f32.mrb[6].mxu1 }
 0x1e2   : > { %v598_v34 = vsel %vm578_vm1, %v562_v25, %v588_v30  ;;  %v568_v35 = vadd.f32 %v567_v33, %v459_v31  ;;  %v569_v36 = vpop.f32.mrb[7].mxu1 }
 0x1e3   : > { %608 = vst [vmem:[%s914_s23 + $0x30] sm:$0xff] %v598_v34  ;;  %v599_v37 = vsel %vm579_vm2, %v564_v28, %v589_v32  ;;  %v570_v38 = vadd.f32 %v569_v36, %v459_v31 }
 0x1e4   : > { %609 = vst [vmem:[%s914_s23 + $0x38] sm:$0xff] %v599_v37  ;;  %vm580_vm3 = vcmp.gt.f32.partialorder %v568_v35, 0.0  ;;  %v590_v39 = vmul.f32 0.01, %v568_v35 }
 0x1e5   : > { %vm581_vm4 = vcmp.gt.f32.partialorder %v570_v38, 0.0  ;;  %v591_v40 = vmul.f32 0.01, %v570_v38 }
 0x1e6   : > { %v600_v41 = vsel %vm580_vm3, %v568_v35, %v590_v39 }
 0x1e7   : > { %610 = vst [vmem:[%s914_s23 + $0x40] sm:$0x1] %v600_v41  ;;  %v601_v42 = vsel %vm581_vm4, %v570_v38, %v591_v40 }
 0x1e8   : > { %611 = vst [vmem:[%s914_s23 + $0x48] sm:$0x1] %v601_v42 }
 0x1e9 PF: > { %s15_s20 = sadd.s32 1, %s785_s20   ;;  %s941_s18 = smov %s781_s19 }
 0x1ea   : > { %p12_p5 = scmp.ge.s32.totalorder %s15_s20, 4   ;;  %s942_s19 = smov %s944_s21 }
 0x1ec   :  { %14 = sbr.rel (!%p12_p5) target bundleno = 2 (0x2), region = 70 }

</bundles_post_ra>
